<compile_context>
chip_gen: v5e
topology: v5e:2x2
jax: 0.10.0
libtpu: 0.0.40
codegen_flags: <defaults>
</compile_context>

<pallas_src>
import functools
import numpy as np
import jax
import jax.numpy as jnp
from jax.experimental import pallas as pl
from jax.experimental.pallas import tpu as pltpu

# Small shapes consistent with the module (original: N=18, C=1024, H=2048).
B = 2      # batch
N = 8      # anatomy_size
C = 128    # in_channel == gc2 out == anatomy_out (required by residual add)
H = 256    # gc1 hidden (2 * C, mirrors 1024 -> 2048)
K = 8      # num_classes
KP = 128   # lane-dense padded output width (K padded to a full vreg lane dim)
LN_EPS = 1e-5


def anaxnet_kernel(feat_ref, adjbd_ref, w1_ref, w2_ref, gamma_ref, beta_ref,
                   fcw_ref, fcb_ref, out_ref):
    feat3 = feat_ref[...]                               # (Bt, N, C) f32
    bt, n, c = feat3.shape
    feat2 = feat3.reshape(bt * n, c)                    # fold batch into M dim
    adj_bd = adjbd_ref[...]                             # (Bt*N, Bt*N) block-diag adj

    # GraphConvolution 1: adj @ (feat @ W1), bf16 MXU operands, f32 accumulate.
    x = jnp.dot(feat2.astype(jnp.bfloat16), w1_ref[...],
                preferred_element_type=jnp.float32)     # (Bt*N, H)
    x = jnp.dot(adj_bd, x, preferred_element_type=jnp.float32)
    x = jnp.where(x > 0, x, 0.2 * x)                    # LeakyReLU(0.2), f32 VPU

    # GraphConvolution 2: adj @ (x @ W2)
    x = jnp.dot(x.astype(jnp.bfloat16), w2_ref[...],
                preferred_element_type=jnp.float32)     # (Bt*N, C)
    x = jnp.dot(adj_bd, x, preferred_element_type=jnp.float32)

    x3 = x.reshape(bt, n, c)

    # attention: softmax(feat @ x^T, axis=-1) @ feat  (per batch element).
    # dot_general contracts the last dims directly -> no materialized transpose.
    att = jax.lax.dot_general(
        feat3, x3,
        dimension_numbers=(((2,), (2,)), ((0,), (0,))),
        preferred_element_type=jnp.float32)             # (Bt, N, N)
    att = att - jnp.max(att, axis=-1, keepdims=True)
    p = jnp.exp(att)
    att = p * pl.reciprocal(jnp.sum(p, axis=-1, keepdims=True), approx=True)
    y = jax.lax.dot_general(
        att, feat3,
        dimension_numbers=(((2,), (1,)), ((0,), (0,))),
        preferred_element_type=jnp.float32)             # (Bt, N, C)

    # residual add + mean over anatomy nodes (torch.mean(..., dim=1))
    y = y + feat3
    m = jnp.mean(y, axis=1)                             # (Bt, C)

    # fc[0]: LayerNorm(C)
    mu = jnp.mean(m, axis=-1, keepdims=True)
    var = jnp.mean((m - mu) ** 2, axis=-1, keepdims=True)
    m = (m - mu) * jax.lax.rsqrt(var + LN_EPS)
    m = m * gamma_ref[...] + beta_ref[...]

    # fc[1]: AdaptiveAvgPool1d(C) on a length-C input is the identity.

    # fc[2]: Linear(C, K) — weight/bias padded to KP lanes for dense stores.
    out = jnp.dot(m, fcw_ref[...], preferred_element_type=jnp.float32) + fcb_ref[...]
    out_ref[0] = out                                    # (Bt, KP) lane-dense write


@functools.partial(jax.jit, static_argnames=("grid_steps",))
def anaxnet_forward(feature, adj, w1, w2, gamma, beta, fc_w, fc_b, *,
                    grid_steps=1):
    b, n, c = feature.shape
    h = w1.shape[1]
    k = fc_w.shape[1]
    kp = ((k + 127) // 128) * 128
    assert b % grid_steps == 0
    bt = b // grid_steps

    # Block-diagonal adjacency: one wide (Bt*N, Bt*N) matmul replaces Bt tiny ones.
    adj_bd = jnp.kron(jnp.eye(bt, dtype=adj.dtype), adj)

    # bf16 weights: halves HBM->VMEM weight traffic, doubles MXU throughput.
    w1_b = w1.astype(jnp.bfloat16)
    w2_b = w2.astype(jnp.bfloat16)

    # Pad the classifier to a lane-dense width; slice back after the kernel.
    fcw_p = jnp.pad(fc_w, ((0, 0), (0, kp - k)))
    fcb_p = jnp.pad(fc_b, ((0, 0), (0, kp - k)))

    cost = pl.CostEstimate(
        flops=int(4 * b * n * c * h + 2 * b * n * n * (h + c)
                  + 4 * b * n * n * c + 2 * b * c * kp),
        transcendentals=int(b * n * n + b * n + b),
        bytes_accessed=int(feature.size * 4 + adj_bd.size * 4
                           + (w1.size + w2.size) * 2
                           + (gamma.size + beta.size) * 4
                           + (fcw_p.size + fcb_p.size) * 4
                           + grid_steps * bt * kp * 4),
    )

    out = pl.pallas_call(
        anaxnet_kernel,
        out_shape=jax.ShapeDtypeStruct((grid_steps, bt, kp), jnp.float32),
        grid_spec=pltpu.PrefetchScalarGridSpec(
            num_scalar_prefetch=0,
            grid=(grid_steps,),
            in_specs=[
                pl.BlockSpec((bt, n, c),        lambda g: (g, 0, 0)),   # feature
                pl.BlockSpec((bt * n, bt * n),  lambda g: (0, 0)),      # block-diag adj
                pl.BlockSpec((c, h),            lambda g: (0, 0)),      # gc1 weight (bf16)
                pl.BlockSpec((h, c),            lambda g: (0, 0)),      # gc2 weight (bf16)
                pl.BlockSpec((1, c),            lambda g: (0, 0)),      # LayerNorm gamma
                pl.BlockSpec((1, c),            lambda g: (0, 0)),      # LayerNorm beta
                pl.BlockSpec((c, kp),           lambda g: (0, 0)),      # fc weight (padded)
                pl.BlockSpec((1, kp),           lambda g: (0, 0)),      # fc bias (padded)
            ],
            out_specs=pl.BlockSpec((1, bt, kp), lambda g: (g, 0, 0)),
        ),
        compiler_params=pltpu.CompilerParams(
            dimension_semantics=("parallel",),
            # Headroom for production shapes (C=1024, H=2048): bf16 W1+W2 = 8 MiB,
            # stays well under this budget even double-buffered.
            vmem_limit_bytes=32 * 1024 * 1024,
        ),
        cost_estimate=cost,
    )(feature, adj_bd, w1_b, w2_b, gamma, beta, fcw_p, fcb_p)

    return out.reshape(b, kp)[:, :k]                    # (B, K)


def _grid_steps_for_device(batch):
    """2 grid steps on v7x (2 TensorCores/chip), 1 on single-TC chips."""
    kind = ""
    try:
        kind = jax.devices()[0].device_kind.lower()
    except Exception:
        pass
    if ("v7" in kind or "7x" in kind) and batch % 2 == 0:
        return 2
    return 1


def reference(feature, adj, w1, w2, gamma, beta, fc_w, fc_b):
    """Pure-JAX f32 reference mirroring the PyTorch forward."""
    x = jnp.einsum('bnc,ch->bnh', feature, w1)
    x = jnp.einsum('mn,bnh->bmh', adj, x)
    x = jnp.where(x > 0, x, 0.2 * x)
    x = jnp.einsum('bnh,hc->bnc', x, w2)
    x = jnp.einsum('mn,bnc->bmc', adj, x)
    att = jnp.einsum('bnc,bmc->bnm', feature, x)
    att = jax.nn.softmax(att, axis=-1)
    x = jnp.einsum('bnm,bmc->bnc', att, feature)
    x = x + feature
    m = jnp.mean(x, axis=1)
    mu = jnp.mean(m, axis=-1, keepdims=True)
    var = jnp.mean((m - mu) ** 2, axis=-1, keepdims=True)
    m = (m - mu) / jnp.sqrt(var + LN_EPS)
    m = m * gamma + beta
    return m @ fc_w + fc_b


if __name__ == "__main__":
    key = jax.random.PRNGKey(0)
    k_feat, k_adj, k_w1, k_w2, k_fcw, k_fcb = jax.random.split(key, 6)

    # Inputs
    feature = jax.random.normal(k_feat, (B, N, C), jnp.float32)

    # Parameters (deterministic, mirroring the PyTorch init shapes / scales).
    # TODO(synk): adjacency is read from a CSV in the original; use a deterministic
    # random stand-in here.
    adj = jax.random.uniform(k_adj, (N, N), jnp.float32)
    stdv1 = 1.0 / np.sqrt(H)
    w1 = jax.random.uniform(k_w1, (C, H), jnp.float32, -stdv1, stdv1)
    stdv2 = 1.0 / np.sqrt(C)
    w2 = jax.random.uniform(k_w2, (H, C), jnp.float32, -stdv2, stdv2)
    gamma = jnp.ones((1, C), jnp.float32)
    beta = jnp.zeros((1, C), jnp.float32)
    kf = 1.0 / np.sqrt(C)
    fc_w = jax.random.uniform(k_fcw, (C, K), jnp.float32, -kf, kf)
    fc_b = jax.random.uniform(k_fcb, (1, K), jnp.float32, -kf, kf)

    grid_steps = _grid_steps_for_device(B)
    out = anaxnet_forward(feature, adj, w1, w2, gamma, beta, fc_w, fc_b,
                          grid_steps=grid_steps)
    out = jax.block_until_ready(out)

    ref = reference(feature, adj, w1, w2, gamma, beta, fc_w, fc_b)
    # Note: bf16 matmul operands + approx softmax reciprocal perturb results
    # slightly vs the f32 reference; well within the stated tolerance.
    np.testing.assert_allclose(np.asarray(out), np.asarray(ref),
                               rtol=5e-2, atol=5e-2)
    assert out.shape == (B, K)
    print("KERNEL_OK")
</pallas_src>

<mosaic_0001>
module attributes {stable_mosaic.version = 11 : i64} {
  func.func @anaxnet_kernel(%arg0: i32, %arg1: memref<2x8x128xf32, #tpu.memory_space<vmem>>, %arg2: memref<16x16xf32, #tpu.memory_space<vmem>>, %arg3: memref<128x256xbf16, #tpu.memory_space<vmem>>, %arg4: memref<256x128xbf16, #tpu.memory_space<vmem>>, %arg5: memref<1x128xf32, #tpu.memory_space<vmem>>, %arg6: memref<1x128xf32, #tpu.memory_space<vmem>>, %arg7: memref<128x128xf32, #tpu.memory_space<vmem>>, %arg8: memref<1x128xf32, #tpu.memory_space<vmem>>, %arg9: memref<1x2x128xf32, #tpu.memory_space<vmem>>) attributes {dimension_semantics = [#tpu.dimension_semantics<parallel>], iteration_bounds = array<i64: 1>, scalar_prefetch = 0 : i64, scratch_operands = 0 : i64, tpu.core_type = #tpu.core_type<tc>, window_params = [{transform_indices = @transform_0, window_bounds = array<i64: 2, 8, 128>}, {pipeline_mode = #tpu.pipeline_mode<synchronous>, transform_indices = @transform_1, window_bounds = array<i64: 16, 16>}, {pipeline_mode = #tpu.pipeline_mode<synchronous>, transform_indices = @transform_2, window_bounds = array<i64: 128, 256>}, {pipeline_mode = #tpu.pipeline_mode<synchronous>, transform_indices = @transform_3, window_bounds = array<i64: 256, 128>}, {pipeline_mode = #tpu.pipeline_mode<synchronous>, transform_indices = @transform_4, window_bounds = array<i64: 1, 128>}, {pipeline_mode = #tpu.pipeline_mode<synchronous>, transform_indices = @transform_5, window_bounds = array<i64: 1, 128>}, {pipeline_mode = #tpu.pipeline_mode<synchronous>, transform_indices = @transform_6, window_bounds = array<i64: 128, 128>}, {pipeline_mode = #tpu.pipeline_mode<synchronous>, transform_indices = @transform_7, window_bounds = array<i64: 1, 128>}, {transform_indices = @transform_8, window_bounds = array<i64: 1, 2, 128>}]} {
    %c0 = arith.constant 0 : index
    %c0_0 = arith.constant 0 : index
    %c0_1 = arith.constant 0 : index
    %0 = vector.load %arg1[%c0, %c0_0, %c0_1] : memref<2x8x128xf32, #tpu.memory_space<vmem>>, vector<2x8x128xf32>
    %1 = vector.shape_cast %0 : vector<2x8x128xf32> to vector<16x128xf32>
    %c0_2 = arith.constant 0 : index
    %c0_3 = arith.constant 0 : index
    %2 = vector.load %arg2[%c0_2, %c0_3] : memref<16x16xf32, #tpu.memory_space<vmem>>, vector<16x16xf32>
    %3 = arith.truncf %1 : vector<16x128xf32> to vector<16x128xbf16>
    %c0_4 = arith.constant 0 : index
    %c0_5 = arith.constant 0 : index
    %4 = vector.load %arg3[%c0_4, %c0_5] : memref<128x256xbf16, #tpu.memory_space<vmem>>, vector<128x256xbf16>
    %cst = arith.constant dense<0.000000e+00> : vector<16x256xf32>
    %5 = tpu.matmul %3, %4, %cst {dimension_numbers = #tpu.dot_dimension_numbers<[1], [0], [0], [1], [0, 0, 1, 1], [], []>} : vector<16x128xbf16>, vector<128x256xbf16>, vector<16x256xf32> -> vector<16x256xf32>
    %cst_6 = arith.constant dense<0.000000e+00> : vector<16x256xf32>
    %6 = tpu.matmul %2, %5, %cst_6 {dimension_numbers = #tpu.dot_dimension_numbers<[1], [0], [0], [1], [0, 0, 1, 1], [], []>} : vector<16x16xf32>, vector<16x256xf32>, vector<16x256xf32> -> vector<16x256xf32>
    %cst_7 = arith.constant 0.000000e+00 : f32
    %7 = vector.broadcast %cst_7 : f32 to vector<16x256xf32>
    %8 = arith.cmpf ogt, %6, %7 : vector<16x256xf32>
    %cst_8 = arith.constant 2.000000e-01 : f32
    %9 = vector.broadcast %cst_8 : f32 to vector<16x256xf32>
    %10 = arith.mulf %9, %6 : vector<16x256xf32>
    %11 = arith.select %8, %6, %10 : vector<16x256xi1>, vector<16x256xf32>
    %12 = arith.truncf %11 : vector<16x256xf32> to vector<16x256xbf16>
    %c0_9 = arith.constant 0 : index
    %c0_10 = arith.constant 0 : index
    %13 = vector.load %arg4[%c0_9, %c0_10] : memref<256x128xbf16, #tpu.memory_space<vmem>>, vector<256x128xbf16>
    %cst_11 = arith.constant dense<0.000000e+00> : vector<16x128xf32>
    %14 = tpu.matmul %12, %13, %cst_11 {dimension_numbers = #tpu.dot_dimension_numbers<[1], [0], [0], [1], [0, 0, 1, 1], [], []>} : vector<16x256xbf16>, vector<256x128xbf16>, vector<16x128xf32> -> vector<16x128xf32>
    %cst_12 = arith.constant dense<0.000000e+00> : vector<16x128xf32>
    %15 = tpu.matmul %2, %14, %cst_12 {dimension_numbers = #tpu.dot_dimension_numbers<[1], [0], [0], [1], [0, 0, 1, 1], [], []>} : vector<16x16xf32>, vector<16x128xf32>, vector<16x128xf32> -> vector<16x128xf32>
    %16 = vector.shape_cast %15 : vector<16x128xf32> to vector<2x8x128xf32>
    %cst_13 = arith.constant dense<0.000000e+00> : vector<2x8x8xf32>
    %17 = tpu.matmul %0, %16, %cst_13 {dimension_numbers = #tpu.dot_dimension_numbers<[2], [2], [1], [1], [0, 0, 0, 1, 1, 1], [0], [0]>} : vector<2x8x128xf32>, vector<2x8x128xf32>, vector<2x8x8xf32> -> vector<2x8x8xf32>
    %cst_14 = arith.constant dense<0xFF800000> : vector<2x8xf32>
    %18 = vector.multi_reduction <maximumf>, %17, %cst_14 [2] : vector<2x8x8xf32> to vector<2x8xf32>
    %19 = vector.shape_cast %18 : vector<2x8xf32> to vector<2x8x1xf32>
    %20 = vector.broadcast %19 : vector<2x8x1xf32> to vector<2x8x8xf32>
    %21 = arith.subf %17, %20 : vector<2x8x8xf32>
    %22 = math.exp %21 : vector<2x8x8xf32>
    %cst_15 = arith.constant dense<0.000000e+00> : vector<2x8xf32>
    %23 = vector.multi_reduction <add>, %22, %cst_15 [2] : vector<2x8x8xf32> to vector<2x8xf32>
    %24 = vector.shape_cast %23 : vector<2x8xf32> to vector<2x8x1xf32>
    %25 = tpu.reciprocal %24 {approx = true} : vector<2x8x1xf32> -> vector<2x8x1xf32>
    %26 = vector.broadcast %25 : vector<2x8x1xf32> to vector<2x8x8xf32>
    %27 = arith.mulf %22, %26 : vector<2x8x8xf32>
    %cst_16 = arith.constant dense<0.000000e+00> : vector<2x8x128xf32>
    %28 = tpu.matmul %27, %0, %cst_16 {dimension_numbers = #tpu.dot_dimension_numbers<[2], [1], [1], [2], [0, 0, 0, 1, 1, 2], [0], [0]>} : vector<2x8x8xf32>, vector<2x8x128xf32>, vector<2x8x128xf32> -> vector<2x8x128xf32>
    %29 = arith.addf %28, %0 : vector<2x8x128xf32>
    %cst_17 = arith.constant dense<0.000000e+00> : vector<2x128xf32>
    %30 = vector.multi_reduction <add>, %29, %cst_17 [1] : vector<2x8x128xf32> to vector<2x128xf32>
    %cst_18 = arith.constant 8.000000e+00 : f32
    %31 = vector.broadcast %cst_18 : f32 to vector<2x128xf32>
    %32 = arith.divf %30, %31 : vector<2x128xf32>
    %cst_19 = arith.constant dense<0.000000e+00> : vector<2xf32>
    %33 = vector.multi_reduction <add>, %32, %cst_19 [1] : vector<2x128xf32> to vector<2xf32>
    %34 = vector.shape_cast %33 : vector<2xf32> to vector<2x1xf32>
    %cst_20 = arith.constant 1.280000e+02 : f32
    %35 = vector.broadcast %cst_20 : f32 to vector<2x1xf32>
    %36 = arith.divf %34, %35 : vector<2x1xf32>
    %37 = vector.broadcast %36 : vector<2x1xf32> to vector<2x128xf32>
    %38 = arith.subf %32, %37 : vector<2x128xf32>
    %39 = arith.mulf %38, %38 : vector<2x128xf32>
    %cst_21 = arith.constant dense<0.000000e+00> : vector<2xf32>
    %40 = vector.multi_reduction <add>, %39, %cst_21 [1] : vector<2x128xf32> to vector<2xf32>
    %41 = vector.shape_cast %40 : vector<2xf32> to vector<2x1xf32>
    %cst_22 = arith.constant 1.280000e+02 : f32
    %42 = vector.broadcast %cst_22 : f32 to vector<2x1xf32>
    %43 = arith.divf %41, %42 : vector<2x1xf32>
    %44 = vector.broadcast %36 : vector<2x1xf32> to vector<2x128xf32>
    %45 = arith.subf %32, %44 : vector<2x128xf32>
    %cst_23 = arith.constant 9.99999974E-6 : f32
    %46 = vector.broadcast %cst_23 : f32 to vector<2x1xf32>
    %47 = arith.addf %43, %46 : vector<2x1xf32>
    %48 = math.rsqrt %47 : vector<2x1xf32>
    %49 = vector.broadcast %48 : vector<2x1xf32> to vector<2x128xf32>
    %50 = arith.mulf %45, %49 : vector<2x128xf32>
    %c0_24 = arith.constant 0 : index
    %c0_25 = arith.constant 0 : index
    %51 = vector.load %arg5[%c0_24, %c0_25] : memref<1x128xf32, #tpu.memory_space<vmem>>, vector<1x128xf32>
    %52 = vector.broadcast %51 : vector<1x128xf32> to vector<2x128xf32>
    %53 = arith.mulf %50, %52 : vector<2x128xf32>
    %c0_26 = arith.constant 0 : index
    %c0_27 = arith.constant 0 : index
    %54 = vector.load %arg6[%c0_26, %c0_27] : memref<1x128xf32, #tpu.memory_space<vmem>>, vector<1x128xf32>
    %55 = vector.broadcast %54 : vector<1x128xf32> to vector<2x128xf32>
    %56 = arith.addf %53, %55 : vector<2x128xf32>
    %c0_28 = arith.constant 0 : index
    %c0_29 = arith.constant 0 : index
    %57 = vector.load %arg7[%c0_28, %c0_29] : memref<128x128xf32, #tpu.memory_space<vmem>>, vector<128x128xf32>
    %cst_30 = arith.constant dense<0.000000e+00> : vector<2x128xf32>
    %58 = tpu.matmul %56, %57, %cst_30 {dimension_numbers = #tpu.dot_dimension_numbers<[1], [0], [0], [1], [0, 0, 1, 1], [], []>} : vector<2x128xf32>, vector<128x128xf32>, vector<2x128xf32> -> vector<2x128xf32>
    %c0_31 = arith.constant 0 : index
    %c0_32 = arith.constant 0 : index
    %59 = vector.load %arg8[%c0_31, %c0_32] : memref<1x128xf32, #tpu.memory_space<vmem>>, vector<1x128xf32>
    %60 = vector.broadcast %59 : vector<1x128xf32> to vector<2x128xf32>
    %61 = arith.addf %58, %60 : vector<2x128xf32>
    %c0_33 = arith.constant 0 : index
    %c0_34 = arith.constant 0 : index
    %c0_35 = arith.constant 0 : index
    %62 = vector.load %arg9[%c0_33, %c0_34, %c0_35] : memref<1x2x128xf32, #tpu.memory_space<vmem>>, vector<1x2x128xf32>
    %63 = vector.shape_cast %62 : vector<1x2x128xf32> to vector<2x128xf32>
    %64 = vector.shape_cast %61 : vector<2x128xf32> to vector<1x2x128xf32>
    tpu.vector_store %arg9[%c0_33, %c0_34, %c0_35], %64 {strides = array<i32>} : memref<1x2x128xf32, #tpu.memory_space<vmem>>, vector<1x2x128xf32>,
    return
  }
  func.func @transform_0(%arg0: i32) -> (i32, i32, i32) {
    %c0_i32 = arith.constant 0 : i32
    %c0_i32_0 = arith.constant 0 : i32
    %c0_i32_1 = arith.constant 0 : i32
    return %arg0, %c0_i32, %c0_i32_0 : i32, i32, i32
  }
  func.func @transform_1(%arg0: i32) -> (i32, i32) {
    %c0_i32 = arith.constant 0 : i32
    %c0_i32_0 = arith.constant 0 : i32
    %c0_i32_1 = arith.constant 0 : i32
    return %c0_i32, %c0_i32_0 : i32, i32
  }
  func.func @transform_2(%arg0: i32) -> (i32, i32) {
    %c0_i32 = arith.constant 0 : i32
    %c0_i32_0 = arith.constant 0 : i32
    %c0_i32_1 = arith.constant 0 : i32
    return %c0_i32, %c0_i32_0 : i32, i32
  }
  func.func @transform_3(%arg0: i32) -> (i32, i32) {
    %c0_i32 = arith.constant 0 : i32
    %c0_i32_0 = arith.constant 0 : i32
    %c0_i32_1 = arith.constant 0 : i32
    return %c0_i32, %c0_i32_0 : i32, i32
  }
  func.func @transform_4(%arg0: i32) -> (i32, i32) {
    %c0_i32 = arith.constant 0 : i32
    %c0_i32_0 = arith.constant 0 : i32
    %c0_i32_1 = arith.constant 0 : i32
    return %c0_i32, %c0_i32_0 : i32, i32
  }
  func.func @transform_5(%arg0: i32) -> (i32, i32) {
    %c0_i32 = arith.constant 0 : i32
    %c0_i32_0 = arith.constant 0 : i32
    %c0_i32_1 = arith.constant 0 : i32
    return %c0_i32, %c0_i32_0 : i32, i32
  }
  func.func @transform_6(%arg0: i32) -> (i32, i32) {
    %c0_i32 = arith.constant 0 : i32
    %c0_i32_0 = arith.constant 0 : i32
    %c0_i32_1 = arith.constant 0 : i32
    return %c0_i32, %c0_i32_0 : i32, i32
  }
  func.func @transform_7(%arg0: i32) -> (i32, i32) {
    %c0_i32 = arith.constant 0 : i32
    %c0_i32_0 = arith.constant 0 : i32
    %c0_i32_1 = arith.constant 0 : i32
    return %c0_i32, %c0_i32_0 : i32, i32
  }
  func.func @transform_8(%arg0: i32) -> (i32, i32, i32) {
    %c0_i32 = arith.constant 0 : i32
    %c0_i32_0 = arith.constant 0 : i32
    %c0_i32_1 = arith.constant 0 : i32
    return %arg0, %c0_i32, %c0_i32_0 : i32, i32, i32
  }
}

</mosaic_0001>

<bundles_post_ra>
// kernel: anaxnet_forward.1
= control target key start
LH: loop header
LB: loop body
LE: loop exit
PB: predicated region body
PF: predicated region fallthrough
CT: control target
= control target key end

     0   :  { %s1174_s0 = inlined_call_operand.vmem [shape: f32[2,8,128], index: 0, kind: input, shape index: {}]   ;;  %s1175_s1 = inlined_call_operand.vmem [shape: f32[16,16], index: 1, kind: input, shape index: {}]   ;;  %s1176_s2 = inlined_call_operand.vmem [shape: bf16[128,256], index: 2, kind: input, shape index: {}]   ;;  %s1177_s3 = inlined_call_operand.vmem [shape: bf16[256,128], index: 3, kind: input, shape index: {}]   ;;  %s1178_s4 = inlined_call_operand.vmem [shape: f32[1,128], index: 4, kind: input, shape index: {}]   ;;  %s1179_s5 = inlined_call_operand.vmem [shape: f32[1,128], index: 5, kind: input, shape index: {}]   ;;  %s1180_s6 = inlined_call_operand.vmem [shape: f32[128,128], index: 6, kind: input, shape index: {}]   ;;  %s1181_s7 = inlined_call_operand.vmem [shape: f32[1,128], index: 7, kind: input, shape index: {}]   ;;  %s1182_s8 = inlined_call_operand.hbm [shape: f32[1,2,128], index: 8, kind: output, shape index: {}]  }
   0x1   :  { %v718_v0 = vld [vmem:[%s1176_s2 + $0x70] sm:$0xf]  ;;  %v811_v1 = vld [vmem:[%s1176_s2 + $0x74] sm:$0xf0]  ;;  %v810_v2 = vld [vmem:[%s1176_s2 + $0x74] sm:$0xf] }
   0x2   :  { %v719_v3 = vor.u32 %v811_v1, %v718_v0  ;;  %v720_v4 = vld [vmem:[%s1176_s2 + $0x78] sm:$0xf0]  ;;  %v710_v5 = vld [vmem:[%s1176_s2 + $0x60] sm:$0xf]  ;;  %v809_v6 = vld [vmem:[%s1176_s2 + $0x64] sm:$0xf0] }
   0x3   :  { %v723_v7 = vor.u32 %v810_v2, %v720_v4  ;;  %v808_v8 = vld [vmem:[%s1176_s2 + $0x64] sm:$0xf]  ;;  %v712_v9 = vld [vmem:[%s1176_s2 + $0x68] sm:$0xf0]  ;;  %v711_v10 = vor.u32 %v809_v6, %v710_v5  ;;  %v702_v12 = vld [vmem:[%s1176_s2 + $0x50] sm:$0xf] }
   0x4   :  { %131 = vmatpush.bf16.msra.mxu0 %v719_v3  ;;  %v715_v11 = vor.u32 %v808_v8, %v712_v9  ;;  %v807_v13 = vld [vmem:[%s1176_s2 + $0x54] sm:$0xf0]  ;;  %v806_v14 = vld [vmem:[%s1176_s2 + $0x54] sm:$0xf]  ;;  %v704_v15 = vld [vmem:[%s1176_s2 + $0x58] sm:$0xf0] }
   0x5   :  { %145 = vmatpush.bf16.msra.mxu1 %v723_v7  ;;  %v703_v16 = vor.u32 %v807_v13, %v702_v12  ;;  %v707_v17 = vor.u32 %v806_v14, %v704_v15  ;;  %v694_v18 = vld [vmem:[%s1176_s2 + $0x40] sm:$0xf]  ;;  %v805_v19 = vld [vmem:[%s1176_s2 + $0x44] sm:$0xf0]  ;;  %v804_v20 = vld [vmem:[%s1176_s2 + $0x44] sm:$0xf] }
   0x6   :  { %v696_v21 = vld [vmem:[%s1176_s2 + $0x48] sm:$0xf0]  ;;  %v695_v22 = vor.u32 %v805_v19, %v694_v18  ;;  %v686_v23 = vld [vmem:[%s1176_s2 + $0x30] sm:$0xf]  ;;  %v803_v25 = vld [vmem:[%s1176_s2 + $0x34] sm:$0xf0] }
   0x7   :  { %v699_v24 = vor.u32 %v804_v20, %v696_v21 }
   0x8   :  { %132 = vmatpush.bf16.msra.mxu0 %v711_v10 }
   0x9   :  { %146 = vmatpush.bf16.msra.mxu1 %v715_v11 }
   0xc   :  { %133 = vmatpush.bf16.msra.mxu0 %v703_v16 }
   0xd   :  { %147 = vmatpush.bf16.msra.mxu1 %v707_v17 }
   0xe   :  { %13 = vsyncpa [#allocation3], 0  ;;  %v802_v26 = vld [vmem:[%s1176_s2 + $0x34] sm:$0xf]  ;;  %v688_v27 = vld [vmem:[%s1176_s2 + $0x38] sm:$0xf0]  ;;  %v687_v28 = vor.u32 %v803_v25, %v686_v23 }
   0xf   :  { %v691_v29 = vor.u32 %v802_v26, %v688_v27  ;;  %v678_v30 = vld [vmem:[%s1176_s2 + $0x20] sm:$0xf]  ;;  %v801_v31 = vld [vmem:[%s1176_s2 + $0x24] sm:$0xf0]  ;;  %v800_v32 = vld [vmem:[%s1176_s2 + $0x24] sm:$0xf] }
  0x10   :  { %134 = vmatpush.bf16.msra.mxu0 %v695_v22  ;;  %v680_v33 = vld [vmem:[%s1176_s2 + $0x28] sm:$0xf0]  ;;  %v679_v34 = vor.u32 %v801_v31, %v678_v30  ;;  %v670_v36 = vld [vmem:[%s1176_s2 + $0x10] sm:$0xf]  ;;  %v799_v37 = vld [vmem:[%s1176_s2 + $0x14] sm:$0xf0] }
  0x11   :  { %148 = vmatpush.bf16.msra.mxu1 %v699_v24  ;;  %v683_v35 = vor.u32 %v800_v32, %v680_v33  ;;  %v798_v38 = vld [vmem:[%s1176_s2 + $0x14] sm:$0xf]  ;;  %v672_v39 = vld [vmem:[%s1176_s2 + $0x18] sm:$0xf0]  ;;  %v671_v40 = vor.u32 %v799_v37, %v670_v36  ;;  %v662_v42 = vld [vmem:[%s1176_s2] sm:$0xf] }
  0x12   :  { %v675_v41 = vor.u32 %v798_v38, %v672_v39  ;;  %v797_v43 = vld [vmem:[%s1176_s2 + $0x4] sm:$0xf0]  ;;  %v796_v44 = vld [vmem:[%s1176_s2 + $0x4] sm:$0xf]  ;;  %v664_v45 = vld [vmem:[%s1176_s2 + $0x8] sm:$0xf0] }
  0x13   :  { %v663_v46 = vor.u32 %v797_v43, %v662_v42  ;;  %v1023_v47 = vld [vmem:[%s1174_s0] sm:$0xff]  ;;  %v1028_v48 = vld [vmem:[%s1174_s0 + $0x8] sm:$0xff]  ;;  %v667_v49 = vor.u32 %v796_v44, %v664_v45  ;;  %vm159_vm0 = vcmask 130048   ;;  %v819_v56 = vld [vmem:[%s1177_s3 + $0x38] sm:$0xff]  ;;  %vm445_vm5 = vcmask 64512   ;;  %s878_s25 = smov [#allocation2]  }
  0x14   :  { %135 = vmatpush.bf16.msra.mxu0 %v687_v28  ;;  %v34_v50 = vpack.c.bf16 %v1028_v48, %v1023_v47  ;;  %v1035_v55 = vld [vmem:[%s1175_s1] sm:$0xff]  ;;  %v827_v57 = vld [vmem:[%s1177_s3 + $0x78] sm:$0xff]  ;;  %v818_v58 = vld [vmem:[%s1177_s3 + $0x30] sm:$0xff]  ;;  %vm537_vm7 = vcmask 1041409   ;;  %vm540_vm8 = vcmask 1041408   ;;  %s649_s26 = sshll.u32 %s878_s25, 4  ;;  %s650_s26 = int_to_ptr.vmem [resolvable:$true] %s649_s26 }
  0x15   :  { %149 = vmatpush.bf16.msra.mxu1 %v691_v29  ;;  %v826_v59 = vld [vmem:[%s1177_s3 + $0x70] sm:$0xff]  ;;  %v33_v60 = vld [vmem:[%s1175_s1 + $0x8] sm:$0xff]  ;;  %v816_v63 = vld [vmem:[%s1177_s3 + $0x20] sm:$0xff]  ;;  %s651_s28 = sshll.u32 %s1182_s8, 4  ;;  %s652_s28 = int_to_ptr.hbm [resolvable:$true] %s651_s28 }
  0x16   :  { %v817_v61 = vld [vmem:[%s1177_s3 + $0x28] sm:$0xff]  ;;  %v824_v0 = vld [vmem:[%s1177_s3 + $0x60] sm:$0xff]  ;;  %v815_v1 = vld [vmem:[%s1177_s3 + $0x18] sm:$0xff] }
  0x17   :  { %v825_v62 = vld [vmem:[%s1177_s3 + $0x68] sm:$0xff]  ;;  %v823_v2 = vld [vmem:[%s1177_s3 + $0x58] sm:$0xff]  ;;  %v814_v3 = vld [vmem:[%s1177_s3 + $0x10] sm:$0xff] }
  0x18   :  { %136 = vmatpush.bf16.msra.mxu0 %v679_v34  ;;  %v822_v4 = vld [vmem:[%s1177_s3 + $0x50] sm:$0xff]  ;;  %v813_v5 = vld [vmem:[%s1177_s3 + $0x8] sm:$0xff]  ;;  %v812_v7 = vld [vmem:[%s1177_s3] sm:$0xff] }
  0x19   :  { %150 = vmatpush.bf16.msra.mxu1 %v683_v35  ;;  %v821_v6 = vld [vmem:[%s1177_s3 + $0x48] sm:$0xff]  ;;  %v820_v8 = vld [vmem:[%s1177_s3 + $0x40] sm:$0xff] }
  0x1c   :  { %137 = vmatpush.bf16.msra.mxu0 %v671_v40 }
  0x1d   :  { %151 = vmatpush.bf16.msra.mxu1 %v675_v41 }
  0x20   :  { %138 = vmatpush.bf16.msra.mxu0 %v663_v46 }
  0x21   :  { %152 = vmatpush.bf16.msra.mxu1 %v667_v49 }
  0x23   :  { %139 = vmatmul.bf16.vlgmr.msra.gmra.mxu0 %v34_v50 }
  0x24   :  { %153 = vmatmul.bf16.vlgmr.msra.gmra.mxu1 %v34_v50 }
  0xa0   :  { %v140_v51 = vpop.f32.mrf.mxu0 }
  0xa1   :  { %v154_v52 = vpop.f32.mrf.mxu1 }
  0xa8   :  { %v142_v53 = vpop.f32.mrf.mxu0 }
  0xa9   :  { %v156_v54 = vpop.f32.mrf.mxu1  ;;  %180 = vmatpush.msra.mxu2 %v142_v53  ;;  %v876_v53 = vmov 8.0  }
  0xaa   :  { %203 = vmatpush.msra.mxu3 %v156_v54 }
  0xab   :  { %181 = vmatpush.msra.mxu2 %v140_v51 }
  0xac   :  { %204 = vmatpush.msra.mxu3 %v154_v52  ;;  %724 = vmatmul.msk.f32.vlgmr.msra.gmra.mxu2 %vm159_vm0, %v1035_v55 }
  0xad   :  { %726 = vmatmul.msk.f32.vlgmr.msra.gmra.mxu3 %vm159_vm0, %v1035_v55  ;;  %354 = vmatpush.bf16.msrb.mxu2 %v819_v56 }
  0xae   :  { %368 = vmatpush.bf16.msrb.mxu3 %v827_v57 }
  0xb1   :  { %355 = vmatpush.bf16.msrb.mxu2 %v818_v58 }
  0xb2   :  { %369 = vmatpush.bf16.msrb.mxu3 %v826_v59 }
  0xb4   :  { %725 = vmatmul.msk.f32.gmra.mxu2 %vm159_vm0, %v33_v60 }
  0xb5   :  { %727 = vmatmul.msk.f32.gmra.mxu3 %vm159_vm0, %v33_v60  ;;  %356 = vmatpush.bf16.msrb.mxu2 %v817_v61 }
  0xb6   :  { %370 = vmatpush.bf16.msrb.mxu3 %v825_v62 }
  0xb9   :  { %357 = vmatpush.bf16.msrb.mxu2 %v816_v63 }
  0xba   :  { %371 = vmatpush.bf16.msrb.mxu3 %v824_v0 }
  0xbd   :  { %358 = vmatpush.bf16.msrb.mxu2 %v815_v1 }
  0xbe   :  { %372 = vmatpush.bf16.msrb.mxu3 %v823_v2 }
  0xc1   :  { %359 = vmatpush.bf16.msrb.mxu2 %v814_v3 }
  0xc2   :  { %373 = vmatpush.bf16.msrb.mxu3 %v822_v4 }
  0xc5   :  { %360 = vmatpush.bf16.msrb.mxu2 %v813_v5 }
  0xc6   :  { %374 = vmatpush.bf16.msrb.mxu3 %v821_v6 }
  0xc9   :  { %361 = vmatpush.bf16.msrb.mxu2 %v812_v7 }
  0xca   :  { %375 = vmatpush.bf16.msrb.mxu3 %v820_v8 }
 0x12f   :  { %v183_v9 = vpop.f32.mrf.mxu2 }
 0x130   :  { %v206_v10 = vpop.f32.mrf.mxu3  ;;  %v216_v11 = vmul.f32 0.2, %v183_v9  ;;  %vm212_vm1 = vcmp.gt.f32.partialorder %v183_v9, 0.0 }
 0x131   :  { %v217_v12 = vmul.f32 0.2, %v206_v10  ;;  %vm213_vm2 = vcmp.gt.f32.partialorder %v206_v10, 0.0 }
 0x132   :  { %v220_v17 = vsel %vm212_vm1, %v183_v9, %v216_v11 }
 0x133   :  { %v221_v19 = vsel %vm213_vm2, %v206_v10, %v217_v12 }
 0x137   :  { %v186_v13 = vpop.f32.mrf.mxu2 }
 0x138   :  { %vm214_vm3 = vcmp.gt.f32.partialorder %v186_v13, 0.0  ;;  %v218_v14 = vmul.f32 0.2, %v186_v13  ;;  %v209_v15 = vpop.f32.mrf.mxu3 }
 0x139   :  { %vm215_vm4 = vcmp.gt.f32.partialorder %v209_v15, 0.0  ;;  %v219_v16 = vmul.f32 0.2, %v209_v15 }
 0x13a   :  { %v222_v18 = vsel %vm214_vm3, %v186_v13, %v218_v14  ;;  %v877_v14 = vmov 128.0  }
 0x13b   :  { %v223_v20 = vsel %vm215_vm4, %v209_v15, %v219_v16  ;;  %v224_v21 = vpack.c.bf16 %v222_v18, %v220_v17 }
 0x13c   :  { %v225_v22 = vpack.c.bf16 %v223_v20, %v221_v19 }
 0x13d   :  { %362 = vmatmul.bf16.vlgmr.msrb.gmra.mxu2 %v224_v21 }
 0x13e   :  { %376 = vmatmul.bf16.vlgmr.msrb.gmra.mxu3 %v225_v22 }
 0x1c0   :  { %v363_v23 = vpop.f32.mrf.mxu2 }
 0x1c1   :  { %v377_v24 = vpop.f32.mrf.mxu3 }
 0x1c2   :  { %v378_v28 = vadd.f32 %v377_v24, %v363_v23 }
 0x1c8   :  { %v365_v25 = vpop.f32.mrf.mxu2 }
 0x1c9   :  { %v379_v26 = vpop.f32.mrf.mxu3 }
 0x1ca   :  { %v380_v27 = vadd.f32 %v379_v26, %v365_v25 }
 0x1cc   :  { %396 = vmatpush.msra.mxu2 %v380_v27  ;;  %828 = vmatpush.msra.mxu3 %v380_v27 }
 0x1ce   :  { %397 = vmatpush.msra.mxu2 %v378_v28  ;;  %829 = vmatpush.msra.mxu3 %v378_v28 }
 0x1cf   :  { %792 = vmatmul.msk.f32.vlgmr.msra.gmra.mxu2 %vm159_vm0, %v1035_v55  ;;  %793 = vmatmul.msk.f32.vlgmr.msra.gmra.mxu3 %vm159_vm0, %v33_v60 }
 0x1d0   :  { %486 = vmatpush.msrb.mxu3 %v1023_v47 }
 0x252   :  { %v399_v29 = vpop.f32.mrf.mxu2  ;;  %v402_v30 = vpop.f32.mrf.mxu3 }
 0x253   :  { %420 = vmatpush.xpose.msrb.mxu1 %v399_v29  ;;  %440 = vmatpush.xpose.msrb.mxu2 %v402_v30 }
 0x256   :  { %421 = vmatmul.f32.vlgmr.msrb.gmra.mxu1 %v1023_v47  ;;  %441 = vmatmul.f32.vlgmr.msrb.gmra.mxu2 %v1028_v48 }
 0x257   :  { %509 = vmatpush.msra.mxu1 %v1028_v48 }
 0x2d3   :  { %v422_v31 = vpop.f32.mrf.mxu1 }
 0x2d4   :  { %v446_v32 = vsel %vm445_vm5, %v422_v31, -inf }
 0x2d5   :  { %447 = vmax.xlane.f32.xlu0 %v446_v32  ;;  %v612_v32 = vld [vmem:[%s1180_s6 + $0x70] sm:$0xff] }
 0x2d9   :  { %v442_v33 = vpop.f32.mrf.mxu2 }
 0x2da   :  { %v449_v34 = vsel %vm445_vm5, %v442_v33, -inf }
 0x2dd   :  { %450 = vmax.xlane.f32.xlu0 %v449_v34  ;;  %v610_v34 = vld [vmem:[%s1180_s6 + $0x60] sm:$0xff] }
 0x348   :  { %v448_v35 = vpop.xlane.xlu0 %447 }
 0x349   :  { %v452_v36 = vsub.f32 %v422_v31, %v448_v35  ;;  %v613_v31 = vld [vmem:[%s1180_s6 + $0x78] sm:$0xff] }
 0x34a   :  { %623 = vmatpush.msrb.mxu0 %v613_v31  ;;  %v609_v35 = vld [vmem:[%s1180_s6 + $0x58] sm:$0xff] }
 0x34b   :  { %v454_v37 = vmul.f32 1.442695, %v452_v36  ;;  %v608_v36 = vld [vmem:[%s1180_s6 + $0x50] sm:$0xff] }
 0x34c   :  { %624 = vmatpush.msrb.mxu0 %v612_v32 }
 0x34d   :  { %836 = vpow2.f32 %v454_v37  ;;  %v607_v37 = vld [vmem:[%s1180_s6 + $0x48] sm:$0xff] }
 0x350   :  { %v451_v38 = vpop.xlane.xlu0 %450 }
 0x351   :  { %v453_v39 = vsub.f32 %v442_v33, %v451_v38  ;;  %v611_v33 = vld [vmem:[%s1180_s6 + $0x68] sm:$0xff]  ;;  %v606_v38 = vld [vmem:[%s1180_s6 + $0x40] sm:$0xff] }
 0x352   :  { %625 = vmatpush.msrb.mxu0 %v611_v33 }
 0x353   :  { %v837_v40 = vpop.eup %836  ;;  %v456_v41 = vmul.f32 1.442695, %v453_v39  ;;  %v605_v39 = vld [vmem:[%s1180_s6 + $0x38] sm:$0xff] }
 0x354   :  { %v458_v42 = vsel %vm445_vm5, %v837_v40, 0.0  ;;  %626 = vmatpush.msrb.mxu0 %v610_v34 }
 0x355   :  { %838 = vpow2.f32 %v456_v41  ;;  %459 = vadd.xlane.f32.xlu1 %v458_v42  ;;  %v603_v41 = vld [vmem:[%s1180_s6 + $0x28] sm:$0xff]  ;;  %v602_v42 = vld [vmem:[%s1180_s6 + $0x20] sm:$0xff] }
 0x356   :  { %627 = vmatpush.msrb.mxu0 %v609_v35 }
 0x358   :  { %628 = vmatpush.msrb.mxu0 %v608_v36 }
 0x35a   :  { %629 = vmatpush.msrb.mxu0 %v607_v37 }
 0x35b   :  { %v839_v43 = vpop.eup %838 }
 0x35c   :  { %v461_v44 = vsel %vm445_vm5, %v839_v43, 0.0  ;;  %630 = vmatpush.msrb.mxu0 %v606_v38 }
 0x35d   :  { %462 = vadd.xlane.f32.xlu1 %v461_v44  ;;  %v600_v44 = vld [vmem:[%s1180_s6 + $0x10] sm:$0xff] }
 0x35e   :  { %631 = vmatpush.msrb.mxu0 %v605_v39 }
 0x3c8   :  { %v460_v45 = vpop.xlane.xlu1 %459 }
 0x3c9   :  { %840 = vrcp.f32 %v460_v45  ;;  %v599_v45 = vld [vmem:[%s1180_s6 + $0x8] sm:$0xff] }
 0x3cf   :  { %v841_v46 = vpop.eup %840 }
 0x3d0   :  { %v466_v49 = vmul.f32 %v841_v46, %v837_v40  ;;  %v463_v50 = vpop.xlane.xlu1 %462  ;;  %v604_v40 = vld [vmem:[%s1180_s6 + $0x30] sm:$0xff]  ;;  %v598_v46 = vld [vmem:[%s1180_s6] sm:$0xff] }
 0x3d1   :  { %842 = vrcp.f32 %v463_v50  ;;  %632 = vmatpush.msrb.mxu0 %v604_v40 }
 0x3d2   :  { %794 = vmatmul.msk.f32.vlgmr.msrb.gmra.mxu3 %vm445_vm5, %v466_v49  ;;  %844 = vrcp.f32 %v876_v53 }
 0x3d3   :  { %846 = vrcp.f32 %v877_v14  ;;  %633 = vmatpush.msrb.mxu0 %v603_v41 }
 0x3d5   :  { %634 = vmatpush.msrb.mxu0 %v602_v42 }
 0x3d7   :  { %v843_v51 = vpop.eup %842 }
 0x3d8   :  { %v467_v52 = vmul.f32 %v843_v51, %v839_v43  ;;  %v845_v54 = vpop.eup %844  ;;  %v601_v43 = vld [vmem:[%s1180_s6 + $0x18] sm:$0xff] }
 0x3d9   :  { %v527_v55 = vmul.f32 8.0, %v845_v54  ;;  %vm531_vm6 = vweird.f32 %v845_v54  ;;  %v847_v15 = vpop.eup %846  ;;  %635 = vmatpush.msrb.mxu0 %v601_v43 }
 0x3da   :  { %795 = vmatmul.msk.f32.vlgmr.msra.gmra.mxu1 %vm445_vm5, %v467_v52  ;;  %v545_v16 = vmul.f32 128.0, %v847_v15  ;;  %vm549_vm9 = vweird.f32 %v847_v15 }
 0x3db   :  { %v528_v59 = vsub.f32 1.0, %v527_v55  ;;  %636 = vmatpush.msrb.mxu0 %v600_v44 }
 0x3dc   :  { %v546_v17 = vsub.f32 1.0, %v545_v16 }
 0x3dd   :  { %v529_v0 = vmul.f32 %v845_v54, %v528_v59  ;;  %637 = vmatpush.msrb.mxu0 %v599_v45 }
 0x3de   :  { %v547_v18 = vmul.f32 %v847_v15, %v546_v17 }
 0x3df   :  { %v530_v5 = vadd.f32 %v845_v54, %v529_v0  ;;  %638 = vmatpush.msrb.mxu0 %v598_v46 }
 0x3e0   :  { %v548_v19 = vadd.f32 %v847_v15, %v547_v18 }
 0x3e1   :  { %v532_v10 = vsel %vm531_vm6, %v845_v54, %v530_v5 }
 0x3e2   :  { %v550_v20 = vsel %vm549_vm9, %v847_v15, %v548_v19 }
 0x455   :  { %v488_v56 = vpop.f32.mrf.mxu3 }
 0x456   :  { %v489_v57 = vadd.f32 %v488_v56, %v1023_v47 }
 0x457   :  { %v511_v58 = vpop.f32.mrf.mxu1 }
 0x458   :  { %v514_v60 = vrot.slane %v489_v57, 4  ;;  %v512_v61 = vadd.f32 %v511_v58, %v1028_v48 }
 0x45a   :  { %v515_v62 = vadd.f32 %v514_v60, %v489_v57  ;;  %v520_v63 = vrot.slane %v512_v61, 4 }
 0x45c   :  { %v516_v1 = vrot.slane %v515_v62, 2  ;;  %v521_v2 = vadd.f32 %v520_v63, %v512_v61  ;;  %v833_v61 = vld [vmem:[%s1178_s4] ss:$0 sm:$0xff] }
 0x45e   :  { %v517_v3 = vadd.f32 %v516_v1, %v515_v62  ;;  %v522_v4 = vrot.slane %v521_v2, 2  ;;  %v834_v1 = vld [vmem:[%s1179_s5] ss:$0 sm:$0xff] }
 0x460   :  { %v518_v6 = vrot.slane %v517_v3, 1  ;;  %v523_v7 = vadd.f32 %v522_v4, %v521_v2 }
 0x462   :  { %v519_v8 = vadd.f32 %v518_v6, %v517_v3  ;;  %v524_v9 = vrot.slane %v523_v7, 1  ;;  %v835_v6 = vld [vmem:[%s1181_s7] ss:$0 sm:$0xff] }
 0x464   :  { %v525_v47 = vadd.f32 %v524_v9, %v523_v7  ;;  %v533_v11 = vmul.f32 %v532_v10, %v519_v8 }
 0x466   :  { %v534_v12 = vmul.f32 %v532_v10, %v525_v47 }
 0x468   :  { %v538_v48 = vsel %vm537_vm7, %v534_v12, %v533_v11 }
 0x469   :  { %v541_v13 = vsel %vm540_vm8, %v538_v48, 0.0 }
 0x46a   :  { %542 = vadd.xlane.f32.xlu2 %v541_v13 }
 0x4dd   :  { %v543_v21 = vpop.xlane.xlu2 %542 }
 0x4de   :  { %v551_v22 = vmul.f32 %v550_v20, %v543_v21 }
 0x4e0   :  { %v553_v23 = vrot.slane %v551_v22, 1  ;;  %v556_v24 = vsub.f32 %v533_v11, %v551_v22 }
 0x4e2   :  { %v557_v25 = vsub.f32 %v534_v12, %v553_v23  ;;  %v558_v27 = vmul.f32 %v556_v24, %v556_v24 }
 0x4e4   :  { %v559_v26 = vmul.f32 %v557_v25, %v557_v25 }
 0x4e6   :  { %v562_v28 = vrot.slane %v559_v26, 7 }
 0x4e8   :  { %v563_v29 = vsel %vm537_vm7, %v562_v28, %v558_v27 }
 0x4e9   :  { %v565_v30 = vsel %vm540_vm8, %v563_v29, 0.0 }
 0x4ea   :  { %566 = vadd.xlane.f32.xlu2 %v565_v30 }
 0x55d   :  { %v567_v49 = vpop.xlane.xlu2 %566 }
 0x55e   :  { %v568_v50 = vmul.f32 %v567_v49, %v550_v20 }
 0x560   :  { %v569_v51 = vadd.f32 1e-05, %v568_v50 }
 0x562   :  { %848 = vrsqrt.f32 %v569_v51  ;;  %vm576_vm11 = vweird.f32 %v569_v51 }
 0x568   :  { %v849_v52 = vpop.eup %848 }
 0x569   :  { %v571_v53 = vmul.f32 %v849_v52, %v569_v51  ;;  %vm577_vm10 = vweird.f32 %v849_v52 }
 0x56a   :  { %vm578_vm12 = vmor %vm576_vm11, %vm577_vm10 }
 0x56b   :  { %v572_v54 = vmul.f32 %v849_v52, %v571_v53 }
 0x56d   :  { %v573_v55 = vmul.f32 0.5, %v572_v54 }
 0x56f   :  { %v574_v56 = vsub.f32 1.5, %v573_v55 }
 0x571   :  { %v575_v57 = vmul.f32 %v849_v52, %v574_v56 }
 0x573   :  { %v579_v58 = vsel %vm578_vm12, %v849_v52, %v575_v57 }
 0x574   :  { %v581_v59 = vrot.slane %v579_v58, 1  ;;  %v584_v60 = vmul.f32 %v579_v58, %v556_v24 }
 0x576   :  { %v585_v62 = vmul.f32 %v581_v59, %v557_v25  ;;  %v590_v63 = vmul.f32 %v833_v61, %v584_v60 }
 0x578   :  { %v591_v0 = vmul.f32 %v833_v61, %v585_v62  ;;  %v596_v3 = vadd.f32 %v834_v1, %v590_v63 }
 0x57a   :  { %v597_v2 = vadd.f32 %v834_v1, %v591_v0 }
 0x57c   :  { %v620_v4 = vrot.slane %v597_v2, 7 }
 0x57e   :  { %v621_v5 = vsel %vm537_vm7, %v620_v4, %v596_v3 }
 0x57f   :  { %639 = vmatmul.f32.vlgmr.msrb.gmra.mxu0 %v621_v5 }
 0x5fc   :  { %v640_v7 = vpop.f32.mrf.mxu0 }
 0x5fd   :  { %v641_v8 = vadd.f32 %v835_v6, %v640_v7 }
 0x5ff   :  { %643 = vst [vmem:[#allocation2] sm:$0x3] %v641_v8 }
 0x600   :  { %654 = dma.vmem_to_hbm [thread:$0]  %s650_s26, 32, %s652_s28, [#allocation3]  }
 0x601   :  { %874 = dma.done.wait [#allocation3], 32  }
 0x602   :  { %875 = vsyncadd [#allocation3], 4294967264 }
 0x603   :  { %659 = vsyncpa [#allocation3], 1 }

</bundles_post_ra>
